<compile_context>
chip_gen: v5e
topology: v5e:2x2
jax: 0.10.0
libtpu: 0.0.40
codegen_flags: <defaults>
</compile_context>

<pallas_src>
import functools
import math

import jax
import jax.numpy as jnp
from jax.experimental import pallas as pl
from jax.experimental.pallas import tpu as pltpu


def _merge_norm_reduce_kernel(x_ref, w0_ref, w1_ref, cw_ref, b_ref, o_ref, *,
                              eps, inv_k, mm_precision):
    """One grid step: a band of H2 row-pairs -> a flat (rows, out_p) output slab.

    x_ref:  (th, 2, W2, 2C)  input band (batch dim squeezed away)
    w0_ref: (2C, out_p)      gamma-folded weight rows for the r=0 slab [a|c]
    w1_ref: (2C, out_p)      gamma-folded weight rows for the r=1 slab [b|d]
    cw_ref: (1, out_p)       column sums of the gamma-folded weight (f32)
    b_ref:  (1, out_p)       beta @ W (f32)
    o_ref:  (th*W2, out_p)   flattened, lane/sublane-dense output slab
    """
    th, _, w2, twoc = x_ref.shape
    rows = th * w2

    # Flatten each 2x2 slab exactly once; the flat view feeds both the matmul
    # and the LN statistics (review: single collapse per slab per tile).
    x0 = x_ref[:, 0, :, :].reshape(rows, twoc)   # [a | c]
    x1 = x_ref[:, 1, :, :].reshape(rows, twoc)   # [b | d]

    # Raw contraction on the MXU (gamma is already folded into w0/w1).
    acc = jnp.dot(x0, w0_ref[...], preferred_element_type=jnp.float32,
                  precision=mm_precision)
    acc = acc + jnp.dot(x1, w1_ref[...], preferred_element_type=jnp.float32,
                        precision=mm_precision)

    # Single-pass LayerNorm statistics over the merged 4C channel (f32).
    x0f = x0.astype(jnp.float32)
    x1f = x1.astype(jnp.float32)
    s1 = jnp.sum(x0f, axis=-1, keepdims=True) + jnp.sum(x1f, axis=-1, keepdims=True)
    s2 = (jnp.sum(x0f * x0f, axis=-1, keepdims=True)
          + jnp.sum(x1f * x1f, axis=-1, keepdims=True))
    mean = s1 * inv_k
    var = jnp.maximum(s2 * inv_k - mean * mean, 0.0)   # biased variance, like torch
    r = jax.lax.rsqrt(var + eps)

    # ((x - mean) * r * gamma) @ W + beta @ W
    #     = r * (x @ Wg) - (mean * r) * colsum(Wg) + beta @ W
    out = acc * r - (mean * r) * cw_ref[...] + b_ref[...]
    o_ref[...] = out.astype(o_ref.dtype)   # flat slab: no reshape, unmasked stores


def _vmem_capacity_bytes():
    """Per-core VMEM capacity; conservative fallback if the query is unavailable."""
    try:
        info = pltpu.get_tpu_info()
        cap = getattr(info, "vmem_capacity_bytes", None)
        if cap and int(cap) >= (8 << 20):
            return int(cap)
    except Exception:
        pass
    return 64 * 1024 * 1024   # v7x per-TensorCore size; safe lower bound everywhere


def _pick_tile_h2(H2, W2, K, out_p, in_itemsize, mm_itemsize, out_itemsize,
                  vmem_budget, target_rows=2048, min_grid=2):
    """Pick tile_h2 (H2 row-pairs per grid step) from a VMEM/row budget.

    No divisor-of-H2 constraint: the caller uses grid = cdiv(H2, tile_h2) and
    Pallas masks the ragged last block.  Returns (tile_h2, est_vmem_bytes).
    """
    # Bytes per merged output row (one (h2, w2) position).
    per_row = (2 * K * in_itemsize        # input block, double-buffered
               + 2 * K * 4                # slab copies + f32 stat temporaries
               + 2 * out_p * out_itemsize # output block, double-buffered
               + 2 * out_p * 4)           # f32 accumulator + corrected rows
    # Resident operands (weights double-buffered by the pipeline) + bias/colsum.
    fixed = 2 * K * out_p * mm_itemsize + 16 * out_p

    avail = max(vmem_budget - fixed, 0)
    max_rows = max(W2, avail // per_row)            # never below one h2 row-pair
    max_rows = min(max_rows, max(target_rows, W2))  # gains flatten past ~1-2K rows
    tile_h2 = max(1, int(max_rows) // W2)

    # Give a second TensorCore (v7x / megacore) at least one grid step.
    if min_grid > 1 and H2 >= min_grid:
        tile_h2 = min(tile_h2, pl.cdiv(H2, min_grid))
    tile_h2 = min(tile_h2, H2)

    # The flattened (tile_h2*W2, out_p) output block must be sublane-aligned
    # unless it spans the full H2*W2 dim.  (8 for 4-byte, 16 for 2-byte, ...)
    sub = max(8, 32 // max(out_itemsize, 1))
    if tile_h2 < H2 and (tile_h2 * W2) % sub != 0:
        step = sub // math.gcd(W2, sub)
        aligned = (tile_h2 // step) * step
        if aligned > 0:
            tile_h2 = aligned
        elif fixed + H2 * W2 * per_row <= 2 * vmem_budget:
            tile_h2 = H2            # small map: take one full (exact) block
        else:
            tile_h2 = step
            # TODO(synk): very wide, misaligned W2 with a huge per-row footprint can
            # still overshoot the budget; a W2-tiling fallback would cover that corner.

    est = fixed + tile_h2 * W2 * per_row
    return tile_h2, est


def patch_merging_2d(x, gamma, beta, w_t, *, eps=1e-5):
    """Pallas implementation of PatchMerging2D.forward.

    x:     (B, H, W, C)   -- module uses x[0] only
    gamma: (4*C,)         -- LayerNorm weight
    beta:  (4*C,)         -- LayerNorm bias
    w_t:   (4*C, out_dim) -- reduction weight, transposed from torch's (out, in)
    returns (ceil(H/2), ceil(W/2), out_dim) in x.dtype
    """
    B, H, W, C = x.shape
    K = 4 * C
    out_dim = w_t.shape[1]

    pad_h, pad_w = H % 2, W % 2
    if pad_h or pad_w:
        # matches F.pad(x, (0, 0, 0, W % 2, 0, H % 2)) on (H, W, C)
        x = jnp.pad(x[:1], ((0, 0), (0, pad_h), (0, pad_w), (0, 0)))
    Hp, Wp = H + pad_h, W + pad_w
    H2, W2 = Hp // 2, Wp // 2

    # Free row-major view: (B, H2, 2, W2, 2C); [i,0,j]=[a|c], [i,1,j]=[b|d].
    xr = x.reshape(x.shape[0], H2, 2, W2, 2 * C)

    # Reorder gamma / the weight rows to the [a, c, b, d] channel order produced
    # by the reshape and fold the LN scale into the matmul.  Bias and colsum are
    # kept in pure f32 (elementwise + reduce; no wrapper-side bf16 matmul).
    perm = jnp.concatenate([jnp.arange(0, C), jnp.arange(2 * C, 3 * C),
                            jnp.arange(C, 2 * C), jnp.arange(3 * C, 4 * C)])
    w_f32 = w_t.astype(jnp.float32)
    g_f32 = gamma.astype(jnp.float32)
    ws = g_f32[perm][:, None] * w_f32[perm, :]                       # (4C, out_dim)
    cw = jnp.sum(g_f32[:, None] * w_f32, axis=0, keepdims=True)      # colsum(Wg)
    bias = jnp.sum(beta.astype(jnp.float32)[:, None] * w_f32,
                   axis=0, keepdims=True)                            # beta @ W

    # Lane-dense output: pad columns up to 128 when out_dim is small.
    out_p = 128 if out_dim < 128 else out_dim
    if out_p != out_dim:
        pad = out_p - out_dim
        ws = jnp.pad(ws, ((0, 0), (0, pad)))
        cw = jnp.pad(cw, ((0, 0), (0, pad)))
        bias = jnp.pad(bias, ((0, 0), (0, pad)))

    # bf16 models: bf16 MXU operands, f32 accumulation / stats.
    # f32 models: faithful f32 via precision=HIGHEST (cheap; kernel is HBM-bound).
    if x.dtype == jnp.float32:
        mm_dtype, mm_precision = jnp.float32, jax.lax.Precision.HIGHEST
    else:
        mm_dtype, mm_precision = x.dtype, jax.lax.Precision.DEFAULT
    w0 = ws[:2 * C].astype(mm_dtype)
    w1 = ws[2 * C:].astype(mm_dtype)
    cw = cw.astype(jnp.float32)
    bias = bias.astype(jnp.float32)

    # Generation-aware VMEM budget / limit (v5e,v6e: 128 MiB; v7x: 64 MiB/TC).
    cap = _vmem_capacity_bytes()
    vmem_budget = int(0.45 * cap)
    in_isz = jnp.dtype(x.dtype).itemsize
    mm_isz = jnp.dtype(mm_dtype).itemsize
    tile_h2, est = _pick_tile_h2(H2, W2, K, out_p, in_isz, mm_isz, in_isz,
                                 vmem_budget)
    vmem_limit = min(int(0.85 * cap), max(int(0.70 * cap), int(1.2 * est)))

    grid = (pl.cdiv(H2, tile_h2),)

    kernel = functools.partial(_merge_norm_reduce_kernel, eps=float(eps),
                               inv_k=1.0 / K, mm_precision=mm_precision)

    out = pl.pallas_call(
        kernel,
        out_shape=jax.ShapeDtypeStruct((H2 * W2, out_p), x.dtype),
        grid=grid,
        in_specs=[
            # batch dim squeezed (module uses x[0] only); H2 tiled in row-pairs,
            # ragged last block handled by Pallas masking.
            pl.BlockSpec((None, tile_h2, 2, W2, 2 * C),
                         lambda i: (0, i, 0, 0, 0)),
            pl.BlockSpec((2 * C, out_p), lambda i: (0, 0)),
            pl.BlockSpec((2 * C, out_p), lambda i: (0, 0)),
            pl.BlockSpec((1, out_p), lambda i: (0, 0)),
            pl.BlockSpec((1, out_p), lambda i: (0, 0)),
        ],
        # Flattened, lane+sublane-dense output slab (unmasked stores).
        out_specs=pl.BlockSpec((tile_h2 * W2, out_p), lambda i: (i, 0)),
        compiler_params=pltpu.CompilerParams(
            dimension_semantics=("parallel",),
            vmem_limit_bytes=vmem_limit),
    )(xr, w0, w1, cw, bias)

    if out_p != out_dim:
        out = out[:, :out_dim]
    return out.reshape(H2, W2, out_dim)


def _reference(x, gamma, beta, w_t, eps=1e-5):
    x0 = x[0]
    H, W, _ = x0.shape
    if H % 2 or W % 2:
        x0 = jnp.pad(x0, ((0, H % 2), (0, W % 2), (0, 0)))
    merged = jnp.concatenate(
        [x0[0::2, 0::2, :], x0[1::2, 0::2, :],
         x0[0::2, 1::2, :], x0[1::2, 1::2, :]], axis=-1).astype(jnp.float32)
    mean = merged.mean(-1, keepdims=True)
    var = ((merged - mean) ** 2).mean(-1, keepdims=True)
    xn = (merged - mean) / jnp.sqrt(var + eps) * gamma.astype(jnp.float32) \
        + beta.astype(jnp.float32)
    return jnp.dot(xn, w_t.astype(jnp.float32),
                   precision=jax.lax.Precision.HIGHEST)


if __name__ == "__main__":
    def run_case(B, H, W, C, key):
        out_dim = 2 * C
        kx, kw, kg, kb = jax.random.split(key, 4)
        x = jax.random.normal(kx, (B, H, W, C), dtype=jnp.float32)

        # nn.Linear(4*dim, 2*dim, bias=False): weight (out, in); pass its transpose.
        bound = 1.0 / (4 * C) ** 0.5
        w = jax.random.uniform(kw, (out_dim, 4 * C), minval=-bound, maxval=bound,
                               dtype=jnp.float32)
        w_t = w.T                                              # (4*dim, out_dim)

        # Non-trivial LayerNorm affine to exercise the gamma/beta folding.
        gamma = 1.0 + 0.1 * jax.random.normal(kg, (4 * C,), dtype=jnp.float32)
        beta = 0.1 * jax.random.normal(kb, (4 * C,), dtype=jnp.float32)

        out = jax.block_until_ready(patch_merging_2d(x, gamma, beta, w_t))
        ref = _reference(x, gamma, beta, w_t)
        H2, W2 = (H + H % 2) // 2, (W + W % 2) // 2
        assert out.shape == (H2, W2, out_dim), out.shape
        err = jnp.max(jnp.abs(out - ref))
        assert jnp.allclose(out, ref, atol=1e-4, rtol=1e-4), f"mismatch, max err {err}"

    key = jax.random.PRNGKey(0)
    k1, k2 = jax.random.split(key)
    run_case(2, 16, 16, 4, k1)   # even spatial: multi-step parallel grid
    run_case(2, 13, 15, 4, k2)   # odd spatial: pad path + ragged last grid block

    print("KERNEL_OK")
</pallas_src>

<mosaic_0001>
module attributes {stable_mosaic.version = 11 : i64} {
  func.func @_merge_norm_reduce_kernel(%arg0: i32, %arg1: memref<1x4x2x8x8xf32, #tpu.memory_space<vmem>>, %arg2: memref<8x128xf32, #tpu.memory_space<vmem>>, %arg3: memref<8x128xf32, #tpu.memory_space<vmem>>, %arg4: memref<1x128xf32, #tpu.memory_space<vmem>>, %arg5: memref<1x128xf32, #tpu.memory_space<vmem>>, %arg6: memref<32x128xf32, #tpu.memory_space<vmem>>) attributes {dimension_semantics = [#tpu.dimension_semantics<parallel>], iteration_bounds = array<i64: 2>, scalar_prefetch = 0 : i64, scratch_operands = 0 : i64, tpu.core_type = #tpu.core_type<tc>, window_params = [{transform_indices = @transform_0, window_bounds = array<i64: 1, 4, 2, 8, 8>}, {pipeline_mode = #tpu.pipeline_mode<synchronous>, transform_indices = @transform_1, window_bounds = array<i64: 8, 128>}, {pipeline_mode = #tpu.pipeline_mode<synchronous>, transform_indices = @transform_2, window_bounds = array<i64: 8, 128>}, {pipeline_mode = #tpu.pipeline_mode<synchronous>, transform_indices = @transform_3, window_bounds = array<i64: 1, 128>}, {pipeline_mode = #tpu.pipeline_mode<synchronous>, transform_indices = @transform_4, window_bounds = array<i64: 1, 128>}, {transform_indices = @transform_5, window_bounds = array<i64: 32, 128>}]} {
    %c0 = arith.constant 0 : index
    %c0_0 = arith.constant 0 : index
    %c0_1 = arith.constant 0 : index
    %c0_2 = arith.constant 0 : index
    %c0_3 = arith.constant 0 : index
    %0 = vector.load %arg1[%c0, %c0_0, %c0_1, %c0_2, %c0_3] : memref<1x4x2x8x8xf32, #tpu.memory_space<vmem>>, vector<1x4x1x8x8xf32>
    %1 = vector.shape_cast %0 : vector<1x4x1x8x8xf32> to vector<4x8x8xf32>
    %2 = vector.shape_cast %1 : vector<4x8x8xf32> to vector<32x8xf32>
    %c0_4 = arith.constant 0 : index
    %c0_5 = arith.constant 0 : index
    %c1 = arith.constant 1 : index
    %c0_6 = arith.constant 0 : index
    %c0_7 = arith.constant 0 : index
    %3 = vector.load %arg1[%c0_4, %c0_5, %c1, %c0_6, %c0_7] : memref<1x4x2x8x8xf32, #tpu.memory_space<vmem>>, vector<1x4x1x8x8xf32>
    %4 = vector.shape_cast %3 : vector<1x4x1x8x8xf32> to vector<4x8x8xf32>
    %5 = vector.shape_cast %4 : vector<4x8x8xf32> to vector<32x8xf32>
    %c0_8 = arith.constant 0 : index
    %c0_9 = arith.constant 0 : index
    %6 = vector.load %arg2[%c0_8, %c0_9] : memref<8x128xf32, #tpu.memory_space<vmem>>, vector<8x128xf32>
    %cst = arith.constant dense<0.000000e+00> : vector<32x128xf32>
    %7 = tpu.matmul %2, %6, %cst {dimension_numbers = #tpu.dot_dimension_numbers<[1], [0], [0], [1], [0, 0, 1, 1], [], []>, precision = #tpu.contract_precision<fp32>} : vector<32x8xf32>, vector<8x128xf32>, vector<32x128xf32> -> vector<32x128xf32>
    %c0_10 = arith.constant 0 : index
    %c0_11 = arith.constant 0 : index
    %8 = vector.load %arg3[%c0_10, %c0_11] : memref<8x128xf32, #tpu.memory_space<vmem>>, vector<8x128xf32>
    %cst_12 = arith.constant dense<0.000000e+00> : vector<32x128xf32>
    %9 = tpu.matmul %5, %8, %cst_12 {dimension_numbers = #tpu.dot_dimension_numbers<[1], [0], [0], [1], [0, 0, 1, 1], [], []>, precision = #tpu.contract_precision<fp32>} : vector<32x8xf32>, vector<8x128xf32>, vector<32x128xf32> -> vector<32x128xf32>
    %10 = arith.addf %7, %9 : vector<32x128xf32>
    %cst_13 = arith.constant dense<0.000000e+00> : vector<32xf32>
    %11 = vector.multi_reduction <add>, %2, %cst_13 [1] : vector<32x8xf32> to vector<32xf32>
    %12 = vector.shape_cast %11 : vector<32xf32> to vector<32x1xf32>
    %cst_14 = arith.constant dense<0.000000e+00> : vector<32xf32>
    %13 = vector.multi_reduction <add>, %5, %cst_14 [1] : vector<32x8xf32> to vector<32xf32>
    %14 = vector.shape_cast %13 : vector<32xf32> to vector<32x1xf32>
    %15 = arith.addf %12, %14 : vector<32x1xf32>
    %16 = arith.mulf %2, %2 : vector<32x8xf32>
    %cst_15 = arith.constant dense<0.000000e+00> : vector<32xf32>
    %17 = vector.multi_reduction <add>, %16, %cst_15 [1] : vector<32x8xf32> to vector<32xf32>
    %18 = vector.shape_cast %17 : vector<32xf32> to vector<32x1xf32>
    %19 = arith.mulf %5, %5 : vector<32x8xf32>
    %cst_16 = arith.constant dense<0.000000e+00> : vector<32xf32>
    %20 = vector.multi_reduction <add>, %19, %cst_16 [1] : vector<32x8xf32> to vector<32xf32>
    %21 = vector.shape_cast %20 : vector<32xf32> to vector<32x1xf32>
    %22 = arith.addf %18, %21 : vector<32x1xf32>
    %cst_17 = arith.constant 6.250000e-02 : f32
    %23 = vector.broadcast %cst_17 : f32 to vector<32x1xf32>
    %24 = arith.mulf %15, %23 : vector<32x1xf32>
    %cst_18 = arith.constant 6.250000e-02 : f32
    %25 = vector.broadcast %cst_18 : f32 to vector<32x1xf32>
    %26 = arith.mulf %22, %25 : vector<32x1xf32>
    %27 = arith.mulf %24, %24 : vector<32x1xf32>
    %28 = arith.subf %26, %27 : vector<32x1xf32>
    %cst_19 = arith.constant 0.000000e+00 : f32
    %29 = vector.broadcast %cst_19 : f32 to vector<32x1xf32>
    %30 = arith.maximumf %28, %29 : vector<32x1xf32>
    %cst_20 = arith.constant 9.99999974E-6 : f32
    %31 = vector.broadcast %cst_20 : f32 to vector<32x1xf32>
    %32 = arith.addf %30, %31 : vector<32x1xf32>
    %33 = math.rsqrt %32 : vector<32x1xf32>
    %34 = vector.broadcast %33 : vector<32x1xf32> to vector<32x128xf32>
    %35 = arith.mulf %10, %34 : vector<32x128xf32>
    %36 = arith.mulf %24, %33 : vector<32x1xf32>
    %c0_21 = arith.constant 0 : index
    %c0_22 = arith.constant 0 : index
    %37 = vector.load %arg4[%c0_21, %c0_22] : memref<1x128xf32, #tpu.memory_space<vmem>>, vector<1x128xf32>
    %38 = vector.broadcast %36 : vector<32x1xf32> to vector<32x128xf32>
    %39 = vector.broadcast %37 : vector<1x128xf32> to vector<32x128xf32>
    %40 = arith.mulf %38, %39 : vector<32x128xf32>
    %41 = arith.subf %35, %40 : vector<32x128xf32>
    %c0_23 = arith.constant 0 : index
    %c0_24 = arith.constant 0 : index
    %42 = vector.load %arg5[%c0_23, %c0_24] : memref<1x128xf32, #tpu.memory_space<vmem>>, vector<1x128xf32>
    %43 = vector.broadcast %42 : vector<1x128xf32> to vector<32x128xf32>
    %44 = arith.addf %41, %43 : vector<32x128xf32>
    %c0_25 = arith.constant 0 : index
    %c0_26 = arith.constant 0 : index
    %45 = vector.load %arg6[%c0_25, %c0_26] : memref<32x128xf32, #tpu.memory_space<vmem>>, vector<32x128xf32>
    tpu.vector_store %arg6[%c0_25, %c0_26], %44 {strides = array<i32>} : memref<32x128xf32, #tpu.memory_space<vmem>>, vector<32x128xf32>,
    return
  }
  func.func @transform_0(%arg0: i32) -> (i32, i32, i32, i32, i32) {
    %c0_i32 = arith.constant 0 : i32
    %c0_i32_0 = arith.constant 0 : i32
    %c0_i32_1 = arith.constant 0 : i32
    %c0_i32_2 = arith.constant 0 : i32
    %c0_i32_3 = arith.constant 0 : i32
    return %c0_i32, %arg0, %c0_i32_0, %c0_i32_1, %c0_i32_2 : i32, i32, i32, i32, i32
  }
  func.func @transform_1(%arg0: i32) -> (i32, i32) {
    %c0_i32 = arith.constant 0 : i32
    %c0_i32_0 = arith.constant 0 : i32
    %c0_i32_1 = arith.constant 0 : i32
    return %c0_i32, %c0_i32_0 : i32, i32
  }
  func.func @transform_2(%arg0: i32) -> (i32, i32) {
    %c0_i32 = arith.constant 0 : i32
    %c0_i32_0 = arith.constant 0 : i32
    %c0_i32_1 = arith.constant 0 : i32
    return %c0_i32, %c0_i32_0 : i32, i32
  }
  func.func @transform_3(%arg0: i32) -> (i32, i32) {
    %c0_i32 = arith.constant 0 : i32
    %c0_i32_0 = arith.constant 0 : i32
    %c0_i32_1 = arith.constant 0 : i32
    return %c0_i32, %c0_i32_0 : i32, i32
  }
  func.func @transform_4(%arg0: i32) -> (i32, i32) {
    %c0_i32 = arith.constant 0 : i32
    %c0_i32_0 = arith.constant 0 : i32
    %c0_i32_1 = arith.constant 0 : i32
    return %c0_i32, %c0_i32_0 : i32, i32
  }
  func.func @transform_5(%arg0: i32) -> (i32, i32) {
    %c0_i32 = arith.constant 0 : i32
    %c0_i32_0 = arith.constant 0 : i32
    return %arg0, %c0_i32 : i32, i32
  }
}

</mosaic_0001>

<bundles_post_ra>
// kernel: tpu_custom_call.1
= control target key start
LH: loop header
LB: loop body
LE: loop exit
PB: predicated region body
PF: predicated region fallthrough
CT: control target
= control target key end

     0   :  { %s1767_s0 = inlined_call_operand.hbm [shape: f32[2,8,2,8,8], index: 0, kind: input, shape index: {}]   ;;  %s1768_s1 = inlined_call_operand.hbm [shape: f32[8,128], index: 1, kind: input, shape index: {}]   ;;  %s1769_s2 = inlined_call_operand.hbm [shape: f32[8,128], index: 2, kind: input, shape index: {}]   ;;  %s1770_s3 = inlined_call_operand.vmem [shape: f32[1,128], index: 3, kind: input, shape index: {}]   ;;  %s1771_s4 = inlined_call_operand.vmem [shape: f32[1,128], index: 4, kind: input, shape index: {}]   ;;  %s1772_s5 = inlined_call_operand.hbm [shape: f32[64,128], index: 5, kind: output, shape index: {}]  }
   0x1   :  { %1773 = sst [smem:[#allocation12_spill]] %s1768_s1 }
   0x2   :  { %1774 = sst [smem:[#allocation13_spill]] %s1769_s2 }
   0x3   :  { %10 = vsyncpa [#allocation3], 0 }
   0x4   :  { %12 = vsyncpa [#allocation3 + $0x1], 0 }
   0x5   :  { %13 = vsyncpa [#allocation6], 0 }
   0x6   :  { %14 = vsyncpa [#allocation4], 0 }
   0x7   :  { %16 = vsyncpa [#allocation4 + $0x1], 0  ;;  %s1364_s18 = smov 0   ;;  %s1366_s19 = smov 0  }
   0x8   :  { %s1368_s20 = smov 0   ;;  %s1370_s21 = smov 0  }
   0x9 LB: > { %s1385_s22 = sadd.s32 4294967295, %s1326_s21   ;;  %s1059_s23 = sadd.s32 4294967294, %s1326_s21   ;;  %s1326_s21 = sphi %s1370_s21, %s1787_s21   ;;  %s1322_s20 = sphi %s1368_s20, %s1786_s20   ;;  %s1318_s19 = sphi %s1366_s19, %s1785_s19   ;;  %s1314_s18 = sphi %s1364_s18, %s1784_s18  }
   0xa   : > { %s1389_s24 = sadd.s32 1, %s1326_s21   ;;  %s29_s25 = sadd.s32 1, %s1322_s20 }
   0xb   : > { %s26_s26 = ssub.s32 %s1326_s21, %s1389_s24  ;;  %p36_p0 = scmp.ne.s32.totalorder %s1322_s20, %s1318_s19 }
   0xc   : > { %p27_p1 = scmp.eq.s32.totalorder %s26_s26, 0  ;;  %p37_p2 = scmp.eq.s32.totalorder %s1326_s21, 0 }
   0xd   : > { %p42_p3 = scmp.ne.s32.totalorder %s1318_s19, %s1314_s18  ;;  %p43_p4 = scmp.eq.s32.totalorder %s1385_s22, 0 }
   0xe   : > { %s1401_s27 = scalar_select %p27_p1, %s1322_s20, %s29_s25  }
   0xf   : > { %p1403_p5 = por %p37_p2, %p36_p0  ;;  %p1409_p6 = por %p43_p4, %p42_p3 }
  0x10   : > { %p150_p7 = scmp.eq.s32.totalorder %s1385_s22, 1  ;;  %p156_p8 = scmp.eq.s32.totalorder %s1059_s23, 1 }
  0x11   : > { %p1060_p9 = scmp.ge.s32.totalorder %s1326_s21, 1  ;;  %p163_p10 = scmp.lt.s32.totalorder %s1326_s21, 3 }
  0x12   : > { %p1416_p11 = por %p150_p7, %p36_p0  ;;  %p1420_p12 = por %p156_p8, %p42_p3 }
  0x13   : > { %p1424_p13 = pnand %p1060_p9, %p163_p10  ;;  %s1780_s1 = sld [smem:[#allocation12_spill]] }
  0x14   : > { %s1328_s11 = smov [#allocation5]   ;;  %p1114_p3 = scmp.lt.s32.totalorder %s1326_s21, 2 }
  0x15   : > { %p1097_p1 = pneg %p1424_p13  ;;  %s177_s12 = sshll.u32 %s1328_s11, 4  ;;  %s178_s12 = int_to_ptr.vmem [resolvable:$true] %s177_s12 }
  0x16   : > { %s1781_s2 = sld [smem:[#allocation13_spill]]  ;;  %p1442_p7 = pnand %p1114_p3, %p1403_p5 }
  0x17   : > { %p1098_p2 = pnand %p1097_p1, %p43_p4  ;;  %s1329_s17 = smov [#allocation7]  }
  0x18   : > { %s189_s23 = sshll.u32 %s1329_s17, 4  ;;  %s206_s25 = sand.u32 1, %s1322_s20   ;;  %s190_s23 = int_to_ptr.vmem [resolvable:$true] %s189_s23 }
  0x19   : > { %s175_s10 = sshll.u32 %s1780_s1, 4  ;;  %s1064_s26 = sshll.u32 %s206_s25, 6  ;;  %s176_s10 = int_to_ptr.hbm [resolvable:$true] %s175_s10 }
  0x1a   : > { %1100 = dma.hbm_to_vmem [thread:$0]  (!%p1098_p2), %s176_s10, 128, %s178_s12, [#allocation6]  }
  0x1b   : > { %s1083_s8 = sshll.u32 %s1326_s21, 6  ;;  %s210_s14 = scalar_lea.vmem [#allocation2], %s1064_s26 }
  0x1c   : > { %s187_s15 = sshll.u32 %s1781_s2, 4  ;;  %s216_s13 = scalar_lea.hbm %s1767_s0, %s1083_s8  ;;  %s188_s15 = int_to_ptr.hbm [resolvable:$true] %s187_s15 }
  0x1d   : > { %1103 = dma.hbm_to_vmem [thread:$0]  (!%p1098_p2), %s188_s15, 128, %s190_s23, [#allocation6]  }
  0x1e   : > { %s219_s1 = sshll.u32 %s210_s14, 4  ;;  %s217_s10 = sshll.u32 %s216_s13, 4  ;;  %s220_s1 = int_to_ptr.vmem [resolvable:$true] %s219_s1  ;;  %s218_s10 = int_to_ptr.hbm [resolvable:$true] %s217_s10 }
  0x1f   : > { %s207_s28 = scalar_lea.sflag [#allocation3], %s206_s25  ;;  %s1226_s12 = sshra.s32 %s218_s10, 4  ;;  %s1227_s12 = int_to_ptr.hbm [resolvable:$true] %s1226_s12 }
  0x20   : > { %s1228_s2 = scalar_lea.hbm %s1227_s12, 64  ;;  %p1230_p8 = pneg %p1442_p7 }
  0x21   : > { %p1229_p5 = scmp.ne.s32.totalorder %s1227_s12, %s1228_s2  ;;  %s1233_s23 = scalar_lea.hbm %s1767_s0, 256 }
  0x22   : > { %p1234_p1 = scmp.lt.s32.totalorder %s1227_s12, %s1767_s0  ;;  %p1235_p2 = scmp.lt.s32.totalorder %s1233_s23, %s1228_s2 }
  0x23   : > { %p1231_p9 = pnand %p1230_p8, %p1229_p5 }
  0x24   : > { %p1236_p3 = por %p1235_p2, %p1234_p1 }
  0x25   : > { %p1232_p10 = pneg %p1231_p9 }
  0x27   : > { %p1237_p0 = pnand %p1236_p3, %p1232_p10 }
  0x29   : > { %1240 = shalt.err (!%p1237_p0)
}
  0x2a   : > { %s1330_s25 = smov 128   ;;  %s1331_s26 = smov 8  }
  0x2b   : > { %1107 = dma.hbm_to_vmem [thread:$0]  (!%p1442_p7), %s218_s10, 1024, %s220_s1, %s207_s28, %s1330_s25, %s1330_s25, %s1331_s26  }
  0x2c   : > { %231 = sbr.rel (%p1424_p13) target bundleno = 296 (0x128), region = 40  ;;  %s1464_s11 = sand.u32 (!%p1424_p13), 1, %s1318_s19  }
  0x2d   : > { %s1069_s13 = sshll.u32 (!%p1424_p13), %s1464_s11, 6  ;;  %s234_s14 = scalar_lea.sflag (!%p1424_p13), [#allocation3], %s1464_s11 }
  0x2e   : > { %s1468_s2 = scalar_lea.vmem (!%p1424_p13), [#allocation2], %s1069_s13 }
  0x31   : > { %1301 = dma.done.wait (%p1409_p6), %s234_s14, 1024  }
  0x32   : > { %1303 = vsyncadd (%p1409_p6), %s234_s14, 4294966272 }
  0x33   : > { %1305 = dma.done.wait (%p43_p4), [#allocation6], 256  }
  0x34   : > { %1307 = vsyncadd (%p43_p4), [#allocation6], 4294967040  ;;  %vm288_vm0 = vcmask 64512   ;;  %v1479_v0 = vld [vmem:[%s1468_s2 + $0x8] sm:$0xff]  ;;  %v1482_v1 = vld [vmem:[%s1468_s2 + $0x20] sm:$0xff]  ;;  %s1072_s7 = sshll.u32 %s1464_s11, 5 }
  0x35   : > { %v1485_v2 = vld [vmem:[%s1468_s2] sm:$0xff]  ;;  %v803_v3 = vsel %vm288_vm0, %v1479_v0, 0.0  ;;  %v290_v4 = vsel %vm288_vm0, %v1479_v0, 0  ;;  %v797_v5 = vsel %vm288_vm0, %v1482_v1, 0.0  ;;  %v287_v6 = vld [vmem:[#allocation7] sm:$0xff]  ;;  %v1499_v13 = vld [vmem:[%s1468_s2 + $0x18] sm:$0xff]  ;;  %v821_v49 = vmul.f32 %v1482_v1, %v1482_v1 }
  0x36   : > { %v286_v7 = vld [vmem:[#allocation5] sm:$0xff]  ;;  %804 = vadd.xlane.f32.xlu2 %v803_v3  ;;  %v1493_v8 = vand.u32 4294901760, %v290_v4  ;;  %798 = vadd.xlane.f32.xlu1 %v797_v5  ;;  %v791_v9 = vsel %vm288_vm0, %v1485_v2, 0.0  ;;  %v316_v10 = vand.u32 4294901760, %v287_v6  ;;  %v1502_v14 = vld [vmem:[%s1468_s2 + $0x30] sm:$0xff]  ;;  %v1508_v19 = vld [vmem:[%s1468_s2 + $0x28] sm:$0xff]  ;;  %v819_v35 = vmul.f32 %v1485_v2, %v1485_v2 }
  0x37   : > { %792 = vadd.xlane.f32.xlu0 %v791_v9  ;;  %v567_v11 = vand.u32 4294901760, %v286_v7  ;;  %v1505_v16 = vld [vmem:[%s1468_s2 + $0x10] sm:$0xff]  ;;  %v806_v20 = vsel %vm288_vm0, %v1499_v13, 0.0  ;;  %v800_v21 = vsel %vm288_vm0, %v1502_v14, 0.0  ;;  %v293_v23 = vsel %vm288_vm0, %v1499_v13, 0  ;;  %v1528_v38 = vld [vmem:[%s1468_s2 + $0x38] sm:$0xff] }
  0x38   : > { %v319_v12 = vsub.f32 %v290_v4, %v1493_v8  ;;  %v367_v15 = vsub.f32 %v287_v6, %v316_v10  ;;  %444 = vmatpush.msra.mxu3 %v316_v10  ;;  %317 = vmatpush.msra.mxu0 %v316_v10  ;;  %v794_v24 = vsel %vm288_vm0, %v1505_v16, 0.0  ;;  %v1518_v27 = vand.u32 4294901760, %v293_v23  ;;  %s1712_s28 = scalar_lea.vmem [#allocation8], %s1072_s7  ;;  %s1084_s12 = sshll.u32 %s1385_s22, 5 }
  0x39   : > { %v618_v18 = vsub.f32 %v286_v7, %v567_v11  ;;  %v296_v29 = vsel %vm288_vm0, %v1508_v19, 0  ;;  %v299_v40 = vsel %vm288_vm0, %v1528_v38, 0  ;;  %v812_v42 = vsel %vm288_vm0, %v1528_v38, 0.0  ;;  %s963_s23 = scalar_lea.hbm %s1772_s5, %s1084_s12  ;;  %s964_s9 = sshll.u32 %s1712_s28, 4  ;;  %s965_s9 = int_to_ptr.vmem [resolvable:$true] %s964_s9 }
  0x3a   : > { %v320_v17 = vand.u32 4294901760, %v319_v12  ;;  %406 = vmatpush.msra.mxu2 %v367_v15  ;;  %v368_v22 = vand.u32 4294901760, %v367_v15  ;;  %v327_v32 = vsub.f32 %v293_v23, %v1518_v27  ;;  %v1523_v33 = vand.u32 4294901760, %v296_v29  ;;  %s966_s8 = sshll.u32 %s963_s23, 4  ;;  %s952_s22 = scalar_lea.sflag [#allocation4], %s1464_s11  ;;  %s967_s8 = int_to_ptr.hbm [resolvable:$true] %s966_s8 }
  0x3b   : > { %409 = vmatmul.f32.vlgmr.msra.gmra.mxu2 %v319_v12  ;;  %v619_v26 = vand.u32 4294901760, %v618_v18  ;;  %v823_v43 = vsel %vm288_vm0, %v819_v35, 0.0  ;;  %v809_v44 = vsel %vm288_vm0, %v1508_v19, 0.0  ;;  %v1539_v47 = vand.u32 4294901760, %v299_v40  ;;  %s1270_s25 = sshra.s32 %s967_s8, 4  ;;  %s1276_s2 = scalar_lea.hbm %s1772_s5, 64  ;;  %s1271_s25 = int_to_ptr.hbm [resolvable:$true] %s1270_s25 }
  0x3c   : > { %448 = vmatmul.f32.vlgmr.msra.gmra.mxu3 %v320_v17  ;;  %v321_v25 = vsub.f32 %v319_v12, %v320_v17  ;;  %568 = vmatpush.msrb.mxu2 %v567_v11  ;;  %v369_v28 = vsub.f32 %v367_v15, %v368_v22  ;;  %v328_v37 = vand.u32 4294901760, %v327_v32  ;;  %v335_v39 = vsub.f32 %v296_v29, %v1523_v33  ;;  %s1272_s26 = scalar_lea.hbm %s1271_s25, 32  ;;  %p1277_p0 = scmp.lt.s32.totalorder %s1271_s25, %s1772_s5 }
  0x3d   : > { %488 = vmatpush.msrb.mxu0 %v368_v22  ;;  %v620_v31 = vsub.f32 %v618_v18, %v619_v26  ;;  %v541_v48 = vsel %vm288_vm0, %v1485_v2, 0  ;;  %v822_v50 = vmul.f32 %v1502_v14, %v1502_v14  ;;  %v820_v52 = vmul.f32 %v1505_v16, %v1505_v16  ;;  %p1273_p4 = scmp.ne.s32.totalorder %s1271_s25, %s1272_s26  ;;  %p1278_p7 = scmp.lt.s32.totalorder %s1276_s2, %s1272_s26 }
  0x3e   : > { %807 = vadd.xlane.f32.xlu2 %v806_v20  ;;  %801 = vadd.xlane.f32.xlu1 %v800_v21  ;;  %v322_v30 = vand.u32 4294901760, %v321_v25  ;;  %v370_v34 = vand.u32 4294901760, %v369_v28  ;;  %v329_v41 = vsub.f32 %v327_v32, %v328_v37  ;;  %v336_v46 = vand.u32 4294901760, %v335_v39 }
  0x3f   : > { %795 = vadd.xlane.f32.xlu0 %v794_v24  ;;  %739 = vmatpush.msra.mxu2 %v619_v26  ;;  %v621_v36 = vand.u32 4294901760, %v620_v31  ;;  %v1547_v51 = vand.u32 4294901760, %v541_v48  ;;  %v343_v54 = vsub.f32 %v299_v40, %v1539_v47  ;;  %v829_v55 = vsel %vm288_vm0, %v821_v49, 0.0  ;;  %p1274_p6 = pnand %p1273_p4, %p1416_p11  ;;  %p1279_p5 = por %p1278_p7, %p1277_p0 }
  0x40   : > { %323 = vmatmul.f32.vlgmr.msra.gmra.mxu0 %v322_v30  ;;  %371 = vmatpush.msra.mxu1 %v370_v34  ;;  %v330_v45 = vand.u32 4294901760, %v329_v41  ;;  %v337_v53 = vsub.f32 %v335_v39, %v336_v46  ;;  %v832_v56 = vsel %vm288_vm0, %v822_v50, 0.0  ;;  %v826_v58 = vsel %vm288_vm0, %v820_v52, 0.0 }
  0x41   : > { %657 = vmatpush.msra.mxu0 %v618_v18  ;;  %373 = vmatmul.f32.vlgmr.msra.gmra.mxu1 %v1493_v8  ;;  %v1556_v57 = vsub.f32 %v541_v48, %v1547_v51  ;;  %v344_v60 = vand.u32 4294901760, %v343_v54  ;;  %v544_v61 = vsel %vm288_vm0, %v1505_v16, 0  ;;  %v836_v62 = vmul.f32 %v1499_v13, %v1499_v13  ;;  %p1275_p13 = pneg %p1274_p6 }
  0x42   : > { %622 = vmatpush.msrb.mxu3 %v621_v36  ;;  %522 = vmatpush.msrb.mxu1 %v316_v10  ;;  %v338_v59 = vand.u32 4294901760, %v337_v53  ;;  %v837_v63 = vmul.f32 %v1508_v19, %v1508_v19  ;;  %v577_v2 = vand.u32 4294901760, %v544_v61  ;;  %v835_v3 = vmul.f32 %v1479_v0, %v1479_v0 }
  0x43   : > { %414 = vmatmul.f32.gmra.mxu2 %v327_v32  ;;  %v345_v4 = vsub.f32 %v343_v54, %v344_v60  ;;  %v571_v5 = vand.u32 4294901760, %v1556_v57  ;;  %v842_v6 = vsel %vm288_vm0, %v836_v62, 0.0  ;;  %v547_v0 = vsel %vm288_vm0, %v1482_v1, 0  ;;  %p1280_p8 = pnand %p1279_p5, %p1275_p13 }
  0x44   : > { %773 = vmatpush.msra.mxu3 %v567_v11  ;;  %695 = vmatpush.msra.mxu1 %v567_v11  ;;  %v845_v7 = vsel %vm288_vm0, %v837_v63, 0.0  ;;  %v578_v9 = vsub.f32 %v544_v61, %v577_v2  ;;  %v839_v10 = vsel %vm288_vm0, %v835_v3, 0.0  ;;  %v585_v13 = vand.u32 4294901760, %v547_v0 }
  0x45   : > { %454 = vmatmul.f32.gmra.mxu3 %v328_v37  ;;  %v346_v11 = vand.u32 4294901760, %v345_v4  ;;  %v572_v12 = vsub.f32 %v1556_v57, %v571_v5  ;;  %v838_v15 = vmul.f32 %v1528_v38, %v1528_v38  ;;  %v550_v1 = vsel %vm288_vm0, %v1502_v14, 0 }
  0x46   : > { %813 = vadd.xlane.f32.xlu1 %v812_v42  ;;  %824 = vadd.xlane.f32.xlu2 %v823_v43  ;;  %v579_v17 = vand.u32 4294901760, %v578_v9  ;;  %v586_v18 = vsub.f32 %v547_v0, %v585_v13  ;;  %v593_v21 = vand.u32 4294901760, %v550_v1 }
  0x47   : > { %810 = vadd.xlane.f32.xlu0 %v809_v44  ;;  %v573_v16 = vand.u32 4294901760, %v572_v12  ;;  %v848_v19 = vsel %vm288_vm0, %v838_v15, 0.0 }
  0x48   : > { %331 = vmatmul.f32.gmra.mxu0 %v330_v45  ;;  %v580_v20 = vsub.f32 %v578_v9, %v579_v17  ;;  %v587_v23 = vand.u32 4294901760, %v586_v18  ;;  %v594_v24 = vsub.f32 %v550_v1, %v593_v21 }
  0x49   : > { %377 = vmatmul.f32.gmra.mxu1 %v1518_v27 }
  0x4a   : > { %v581_v22 = vand.u32 4294901760, %v580_v20  ;;  %v588_v25 = vsub.f32 %v586_v18, %v587_v23  ;;  %v595_v28 = vand.u32 4294901760, %v594_v24 }
  0x4b   : > { %419 = vmatmul.f32.gmra.mxu2 %v335_v39 }
  0x4c   : > { %v589_v26 = vand.u32 4294901760, %v588_v25  ;;  %v596_v14 = vsub.f32 %v594_v24, %v595_v28 }
  0x4d   : > { %460 = vmatmul.f32.gmra.mxu3 %v336_v46 }
  0x4e   : > { %830 = vadd.xlane.f32.xlu1 %v829_v55  ;;  %833 = vadd.xlane.f32.xlu2 %v832_v56  ;;  %v597_v29 = vand.u32 4294901760, %v596_v14 }
  0x4f   : > { %827 = vadd.xlane.f32.xlu0 %v826_v58 }
  0x50   : > { %339 = vmatmul.f32.gmra.mxu0 %v338_v59 }
  0x51   : > { %381 = vmatmul.f32.gmra.mxu1 %v1523_v33 }
  0x53   : > { %424 = vmatmul.f32.gmra.mxu2 %v343_v54 }
  0x55   : > { %466 = vmatmul.f32.gmra.mxu3 %v344_v60 }
  0x56   : > { %843 = vadd.xlane.f32.xlu1 %v842_v6  ;;  %846 = vadd.xlane.f32.xlu2 %v845_v7 }
  0x57   : > { %840 = vadd.xlane.f32.xlu0 %v839_v10 }
  0x58   : > { %347 = vmatmul.f32.gmra.mxu0 %v346_v11 }
  0x59   : > { %385 = vmatmul.f32.gmra.mxu1 %v1539_v47 }
  0x5b   : > { %574 = vmatmul.f32.vlgmr.msrb.gmra.mxu2 %v573_v16 }
  0x5d   : > { %624 = vmatmul.f32.vlgmr.msrb.gmra.mxu3 %v1547_v51 }
  0x5f   : > { %849 = vadd.xlane.f32.xlu0 %v848_v19 }
  0x60   : > { %490 = vmatmul.f32.vlgmr.msrb.gmra.mxu0 %v1493_v8 }
  0x61   : > { %524 = vmatmul.f32.vlgmr.msrb.gmra.mxu1 %v1493_v8 }
  0x63   : > { %582 = vmatmul.f32.gmra.mxu2 %v581_v22 }
  0x65   : > { %628 = vmatmul.f32.gmra.mxu3 %v577_v2 }
  0x68   : > { %494 = vmatmul.f32.gmra.mxu0 %v1518_v27 }
  0x69   : > { %528 = vmatmul.f32.gmra.mxu1 %v1518_v27 }
  0x6b   : > { %590 = vmatmul.f32.gmra.mxu2 %v589_v26 }
  0x6d   : > { %632 = vmatmul.f32.gmra.mxu3 %v585_v13 }
  0x70   : > { %498 = vmatmul.f32.gmra.mxu0 %v1523_v33 }
  0x71   : > { %532 = vmatmul.f32.gmra.mxu1 %v1523_v33 }
  0x73   : > { %598 = vmatmul.f32.gmra.mxu2 %v597_v29 }
  0x75   : > { %636 = vmatmul.f32.gmra.mxu3 %v593_v21 }
  0x78   : > { %502 = vmatmul.f32.gmra.mxu0 %v1539_v47 }
  0x79   : > { %536 = vmatmul.f32.gmra.mxu1 %v1539_v47 }
  0x7b   : > { %741 = vmatmul.f32.vlgmr.msra.gmra.mxu2 %v1547_v51 }
  0x7d   : > { %775 = vmatmul.f32.vlgmr.msra.gmra.mxu3 %v1547_v51 }
  0x80   : > { %660 = vmatmul.f32.vlgmr.msra.gmra.mxu0 %v1556_v57 }
  0x81   : > { %699 = vmatmul.f32.vlgmr.msra.gmra.mxu1 %v571_v5 }
  0x83   : > { %745 = vmatmul.f32.gmra.mxu2 %v577_v2 }
  0x85   : > { %779 = vmatmul.f32.gmra.mxu3 %v577_v2 }
  0x88   : > { %665 = vmatmul.f32.gmra.mxu0 %v578_v9 }
  0x89   : > { %705 = vmatmul.f32.gmra.mxu1 %v579_v17 }
  0x8b   : > { %749 = vmatmul.f32.gmra.mxu2 %v585_v13 }
  0x8d   : > { %783 = vmatmul.f32.gmra.mxu3 %v585_v13 }
  0x90   : > { %670 = vmatmul.f32.gmra.mxu0 %v586_v18 }
  0x91   : > { %711 = vmatmul.f32.gmra.mxu1 %v587_v23 }
  0x93   : > { %753 = vmatmul.f32.gmra.mxu2 %v593_v21 }
  0x95   : > { %787 = vmatmul.f32.gmra.mxu3 %v593_v21 }
  0x98   : > { %675 = vmatmul.f32.gmra.mxu0 %v594_v24 }
  0x99   : > { %717 = vmatmul.f32.gmra.mxu1 %v595_v28 }
  0xa9   : > { %v799_v8 = vpop.xlane.xlu1 %798  ;;  %v805_v30 = vpop.xlane.xlu2 %804 }
  0xaa   : > { %v793_v27 = vpop.xlane.xlu0 %792 }
  0xab   : > { %v815_v47 = vadd.f32 %v805_v30, %v793_v27 }
  0xad   : > { %v1603_v50 = vmul.f32 0.0625, %v815_v47 }
  0xaf   : > { %v863_v56 = vmul.f32 %v1603_v50, %v1603_v50 }
  0xb1   : > { %v802_v32 = vpop.xlane.xlu1 %801  ;;  %v808_v34 = vpop.xlane.xlu2 %807 }
  0xb2   : > { %v796_v31 = vpop.xlane.xlu0 %795 }
  0xb3   : > { %v816_v57 = vadd.f32 %v808_v34, %v796_v31 }
  0xb5   : > { %v1615_v61 = vmul.f32 0.0625, %v816_v57 }
  0xb7   : > { %v864_v5 = vmul.f32 %v1615_v61, %v1615_v61 }
  0xb9   : > { %v814_v36 = vpop.xlane.xlu1 %813  ;;  %v825_v42 = vpop.xlane.xlu2 %824 }
  0xba   : > { %v811_v33 = vpop.xlane.xlu0 %810  ;;  %v818_v19 = vadd.f32 %v814_v36, %v802_v32 }
  0xbb   : > { %v817_v6 = vadd.f32 %v811_v33, %v799_v8 }
  0xbc   : > { %v1632_v23 = vmul.f32 0.0625, %v818_v19 }
  0xbd   : > { %v324_v35 = vpop.f32.mrf.mxu0  ;;  %v1625_v12 = vmul.f32 0.0625, %v817_v6 }
  0xbe   : > { %v374_v37 = vpop.f32.mrf.mxu1  ;;  %v410_v38 = vpop.f32.mrf.mxu2  ;;  %v866_v31 = vmul.f32 %v1632_v23, %v1632_v23 }
  0xbf   : > { %v1593_v39 = vpop.f32.mrf.mxu3  ;;  %v865_v20 = vmul.f32 %v1625_v12, %v1625_v12  ;;  %v375_v25 = vadd.f32 %v374_v37, %v324_v35 }
  0xc1   : > { %v831_v46 = vpop.xlane.xlu1 %830  ;;  %v834_v55 = vpop.xlane.xlu2 %833  ;;  %v411_v32 = vadd.f32 %v410_v38, %v375_v25 }
  0xc2   : > { %v828_v40 = vpop.xlane.xlu0 %827 }
  0xc3   : > { %v450_v37 = vadd.f32 %v1593_v39, %v411_v32 }
  0xc5   : > { %v1595_v41 = vpop.f32.mrf.mxu0 }
  0xc6   : > { %v378_v43 = vpop.f32.mrf.mxu1  ;;  %v1597_v44 = vpop.f32.mrf.mxu2 }
  0xc8   : > { %v1599_v45 = vpop.f32.mrf.mxu3 }
  0xc9   : > { %v844_v59 = vpop.xlane.xlu1 %843  ;;  %v847_v10 = vpop.xlane.xlu2 %846 }
  0xca   : > { %v841_v48 = vpop.xlane.xlu0 %840  ;;  %v852_v62 = vadd.f32 %v844_v59, %v828_v40  ;;  %v853_v13 = vadd.f32 %v847_v10, %v831_v46  ;;  %v379_v40 = vadd.f32 %v378_v43, %v1595_v41 }
  0xcb   : > { %v851_v51 = vadd.f32 %v841_v48, %v825_v42 }
  0xcc   : > { %v860_v7 = vmul.f32 0.0625, %v852_v62  ;;  %v861_v21 = vmul.f32 0.0625, %v853_v13  ;;  %v416_v57 = vadd.f32 %v1597_v44, %v379_v40 }
  0xcd   : > { %v1601_v49 = vpop.f32.mrf.mxu0  ;;  %v859_v58 = vmul.f32 0.0625, %v851_v51 }
  0xce   : > { %v1605_v52 = vpop.f32.mrf.mxu1  ;;  %v1607_v53 = vpop.f32.mrf.mxu2  ;;  %v868_v0 = vsub.f32 %v860_v7, %v864_v5  ;;  %v869_v28 = vsub.f32 %v861_v21, %v865_v20  ;;  %v456_v62 = vadd.f32 %v1599_v45, %v416_v57 }
  0xcf   : > { %v867_v63 = vsub.f32 %v859_v58, %v863_v56 }
  0xd0   : > { %v1609_v54 = vpop.f32.mrf.mxu3  ;;  %v872_v1 = vmax.f32 %v868_v0, 0.0  ;;  %v873_v33 = vmax.f32 %v869_v28, 0.0 }
  0xd1   : > { %v871_v9 = vmax.f32 %v867_v63, 0.0  ;;  %v383_v63 = vadd.f32 %v1605_v52, %v1601_v49 }
  0xd2   : > { %v850_v22 = vpop.xlane.xlu0 %849  ;;  %v1634_v26 = vadd.f32 1e-05, %v872_v1  ;;  %v1644_v42 = vadd.f32 1e-05, %v873_v33 }
  0xd3   : > { %v1627_v15 = vadd.f32 1e-05, %v871_v9  ;;  %v854_v14 = vadd.f32 %v850_v22, %v834_v55  ;;  %v421_v45 = vadd.f32 %v1607_v53, %v383_v63 }
  0xd4   : > { %vm895_vm4 = vweird.f32 %v1634_v26  ;;  %vm905_vm7 = vweird.f32 %v1644_v42 }
  0xd5   : > { %v1613_v60 = vpop.f32.mrf.mxu0  ;;  %1158 = vrsqrt.f32 %v1627_v15  ;;  %v862_v34 = vmul.f32 0.0625, %v854_v14  ;;  %vm885_vm1 = vweird.f32 %v1627_v15 }
  0xd6   : > { %v1617_v2 = vpop.f32.mrf.mxu1  ;;  %v1619_v3 = vpop.f32.mrf.mxu2  ;;  %1160 = vrsqrt.f32 %v1634_v26 }
  0xd7   : > { %v870_v46 = vsub.f32 %v862_v34, %v866_v31  ;;  %1162 = vrsqrt.f32 %v1644_v42  ;;  %v387_v21 = vadd.f32 %v1617_v2, %v1613_v60 }
  0xd8   : > { %v1621_v4 = vpop.f32.mrf.mxu3 }
  0xd9   : > { %v874_v58 = vmax.f32 %v870_v46, 0.0  ;;  %v1700_v46 = vld [vmem:[%s1771_s4] ss:$0 sm:$0xff] }
  0xdb   : > { %v1159_v27 = vpop.eup %1158  ;;  %v1659_v5 = vadd.f32 1e-05, %v874_v58 }
  0xdc   : > { %v880_v36 = vmul.f32 %v1159_v27, %v1627_v15  ;;  %v1648_v55 = vpop.eup %1160  ;;  %vm886_vm2 = vweird.f32 %v1159_v27 }
  0xdd   : > { %v491_v11 = vpop.f32.mrf.mxu0  ;;  %v890_v39 = vmul.f32 %v1648_v55, %v1634_v26  ;;  %v1666_v10 = vpop.eup %1162  ;;  %1164 = vrsqrt.f32 %v1659_v5  ;;  %vm887_vm3 = vmor %vm885_vm1, %vm886_vm2  ;;  %vm896_vm5 = vweird.f32 %v1648_v55  ;;  %vm915_vm10 = vweird.f32 %v1659_v5 }
  0xde   : > { %v525_v16 = vpop.f32.mrf.mxu1  ;;  %v575_v17 = vpop.f32.mrf.mxu2  ;;  %v881_v47 = vmul.f32 %v1159_v27, %v880_v36  ;;  %v492_v38 = vadd.f32 %v491_v11, %v450_v37  ;;  %v900_v49 = vmul.f32 %v1666_v10, %v1644_v42  ;;  %vm897_vm6 = vmor %vm895_vm4, %vm896_vm5  ;;  %vm906_vm8 = vweird.f32 %v1666_v10 }
  0xdf   : > { %v891_v6 = vmul.f32 %v1648_v55, %v890_v39  ;;  %vm907_vm9 = vmor %vm905_vm7, %vm906_vm8 }
  0xe0   : > { %v625_v18 = vpop.f32.mrf.mxu3  ;;  %v882_v41 = vmul.f32 0.5, %v881_v47  ;;  %v526_v43 = vadd.f32 %v525_v16, %v492_v38  ;;  %v901_v22 = vmul.f32 %v1666_v10, %v900_v49 }
  0xe1   : > { %v892_v16 = vmul.f32 0.5, %v891_v6 }
  0xe2   : > { %v883_v9 = vsub.f32 1.5, %v882_v41  ;;  %v576_v11 = vadd.f32 %v575_v17, %v526_v43  ;;  %v462_v17 = vadd.f32 %v1609_v54, %v421_v45  ;;  %v426_v54 = vadd.f32 %v1619_v3, %v387_v21 }
  0xe3   : > { %v893_v28 = vsub.f32 1.5, %v892_v16  ;;  %v1679_v14 = vpop.eup %1164  ;;  %v902_v34 = vmul.f32 0.5, %v901_v22 }
  0xe4   : > { %v884_v52 = vmul.f32 %v1159_v27, %v883_v9  ;;  %v626_v19 = vadd.f32 %v625_v18, %v576_v11  ;;  %v468_v37 = vadd.f32 %v1621_v4, %v426_v54  ;;  %vm916_vm11 = vweird.f32 %v1679_v14 }
  0xe5   : > { %v495_v24 = vpop.f32.mrf.mxu0  ;;  %v894_v33 = vmul.f32 %v1648_v55, %v893_v28  ;;  %v903_v58 = vsub.f32 1.5, %v902_v34  ;;  %vm917_vm12 = vmor %vm915_vm10, %vm916_vm11 }
  0xe6   : > { %v529_v29 = vpop.f32.mrf.mxu1  ;;  %v583_v8 = vpop.f32.mrf.mxu2  ;;  %v496_v0 = vadd.f32 %v495_v24, %v456_v62  ;;  %v888_v25 = vsel %vm887_vm3, %v1159_v27, %v884_v52  ;;  %v1688_v27 = vld [vmem:[%s1770_s3] ss:$0 sm:$0xff] }
  0xe7   : > { %v923_v2 = vmul.f32 %v888_v25, %v1603_v50  ;;  %v904_v11 = vmul.f32 %v1666_v10, %v903_v58 }
  0xe8   : > { %v1636_v30 = vpop.f32.mrf.mxu3  ;;  %v530_v20 = vadd.f32 %v529_v29, %v496_v0 }
  0xe9   : > { %v931_v40 = vmul.f32 %v1688_v27, %v923_v2 }
  0xea   : > { %v584_v31 = vadd.f32 %v583_v8, %v530_v20  ;;  %v910_v8 = vmul.f32 %v1679_v14, %v1659_v5 }
  0xec   : > { %v630_v26 = vadd.f32 %v1636_v30, %v584_v31  ;;  %v911_v38 = vmul.f32 %v1679_v14, %v910_v8 }
  0xed   : > { %v499_v35 = vpop.f32.mrf.mxu0 }
  0xee   : > { %v533_v48 = vpop.f32.mrf.mxu1  ;;  %v1646_v51 = vpop.f32.mrf.mxu2  ;;  %v500_v32 = vadd.f32 %v499_v35, %v462_v17  ;;  %v912_v0 = vmul.f32 0.5, %v911_v38 }
  0xf0   : > { %v1650_v56 = vpop.f32.mrf.mxu3  ;;  %v534_v36 = vadd.f32 %v533_v48, %v500_v32  ;;  %v898_v48 = vsel %vm897_vm6, %v1648_v55, %v894_v33  ;;  %v913_v20 = vsub.f32 1.5, %v912_v0 }
  0xf1   : > { %v924_v9 = vmul.f32 %v898_v48, %v1615_v61 }
  0xf2   : > { %v592_v39 = vadd.f32 %v1646_v51, %v534_v36 }
  0xf3   : > { %v932_v49 = vmul.f32 %v1688_v27, %v924_v9 }
  0xf4   : > { %v634_v55 = vadd.f32 %v1650_v56, %v592_v39 }
  0xf5   : > { %v503_v59 = vpop.f32.mrf.mxu0 }
  0xf6   : > { %v1662_v7 = vpop.f32.mrf.mxu1  ;;  %v1664_v44 = vpop.f32.mrf.mxu2  ;;  %v504_v4 = vadd.f32 %v503_v59, %v468_v37 }
  0xf8   : > { %v1668_v13 = vpop.f32.mrf.mxu3  ;;  %v538_v51 = vadd.f32 %v1662_v7, %v504_v4 }
  0xfa   : > { %v600_v56 = vadd.f32 %v1664_v44, %v538_v51 }
  0xfd   : > { %v661_v1 = vpop.f32.mrf.mxu0 }
  0xfe   : > { %v662_v15 = vadd.f32 %v661_v1, %v626_v19  ;;  %v700_v53 = vpop.f32.mrf.mxu1  ;;  %v742_v24 = vpop.f32.mrf.mxu2  ;;  %v908_v19 = vsel %vm907_vm9, %v1666_v10, %v904_v11  ;;  %v638_v10 = vadd.f32 %v1668_v13, %v600_v56 }
  0xff   : > { %v925_v22 = vmul.f32 %v908_v19, %v1625_v12 }
 0x100   : > { %v701_v18 = vadd.f32 %v700_v53, %v662_v15  ;;  %v776_v29 = vpop.f32.mrf.mxu3  ;;  %v914_v53 = vmul.f32 %v1679_v14, %v913_v20 }
 0x101   : > { %v933_v5 = vmul.f32 %v1688_v27, %v925_v22 }
 0x102   : > { %v743_v60 = vadd.f32 %v742_v24, %v701_v18  ;;  %v918_v18 = vsel %vm917_vm12, %v1679_v14, %v914_v53 }
 0x103   : > { %v926_v2 = vmul.f32 %v918_v18, %v1632_v23 }
 0x104   : > { %v777_v35 = vadd.f32 %v776_v29, %v743_v60 }
 0x105   : > { %v666_v3 = vpop.f32.mrf.mxu0  ;;  %v934_v33 = vmul.f32 %v1688_v27, %v926_v2 }
 0x106   : > { %v919_v50 = vmul.f32 %v888_v25, %v777_v35  ;;  %v667_v47 = vadd.f32 %v666_v3, %v630_v26  ;;  %v706_v57 = vpop.f32.mrf.mxu1  ;;  %v746_v30 = vpop.f32.mrf.mxu2 }
 0x108   : > { %v935_v41 = vsub.f32 %v919_v50, %v931_v40  ;;  %v707_v43 = vadd.f32 %v706_v57, %v667_v47  ;;  %v780_v62 = vpop.f32.mrf.mxu3 }
 0x10a   : > { %v943_v63 = vadd.f32 %v1700_v46, %v935_v41  ;;  %v747_v6 = vadd.f32 %v746_v30, %v707_v43 }
 0x10c   : > { %947 = vst [vmem:[%s1712_s28] sm:$0xff] %v943_v63  ;;  %v781_v59 = vadd.f32 %v780_v62, %v747_v6 }
 0x10d   : > { %v671_v42 = vpop.f32.mrf.mxu0 }
 0x10e   : > { %v920_v45 = vmul.f32 %v898_v48, %v781_v59  ;;  %v672_v52 = vadd.f32 %v671_v42, %v634_v55  ;;  %v712_v61 = vpop.f32.mrf.mxu1  ;;  %v750_v16 = vpop.f32.mrf.mxu2 }
 0x110   : > { %v936_v7 = vsub.f32 %v920_v45, %v932_v49  ;;  %v713_v1 = vadd.f32 %v712_v61, %v672_v52  ;;  %v784_v17 = vpop.f32.mrf.mxu3 }
 0x112   : > { %v944_v21 = vadd.f32 %v1700_v46, %v936_v7  ;;  %v751_v15 = vadd.f32 %v750_v16, %v713_v1 }
 0x114   : > { %948 = vst [vmem:[%s1712_s28 + $0x8] sm:$0xff] %v944_v21  ;;  %v785_v24 = vadd.f32 %v784_v17, %v751_v15 }
 0x115   : > { %v676_v44 = vpop.f32.mrf.mxu0 }
 0x116   : > { %v921_v25 = vmul.f32 %v908_v19, %v785_v24  ;;  %v677_v28 = vadd.f32 %v676_v44, %v638_v10  ;;  %v718_v31 = vpop.f32.mrf.mxu1  ;;  %v754_v32 = vpop.f32.mrf.mxu2 }
 0x118   : > { %v937_v12 = vsub.f32 %v921_v25, %v933_v5  ;;  %v719_v29 = vadd.f32 %v718_v31, %v677_v28  ;;  %v788_v54 = vpop.f32.mrf.mxu3 }
 0x11a   : > { %v945_v13 = vadd.f32 %v1700_v46, %v937_v12  ;;  %v755_v60 = vadd.f32 %v754_v32, %v719_v29 }
 0x11c   : > { %949 = vst [vmem:[%s1712_s28 + $0x10] sm:$0xff] %v945_v13  ;;  %v789_v8 = vadd.f32 %v788_v54, %v755_v60 }
 0x11e   : > { %v922_v14 = vmul.f32 %v918_v18, %v789_v8 }
 0x120   : > { %v938_v34 = vsub.f32 %v922_v14, %v934_v33 }
 0x122   : > { %v946_v26 = vadd.f32 %v1700_v46, %v938_v34 }
 0x124   : > { %950 = vst [vmem:[%s1712_s28 + $0x18] sm:$0xff] %v946_v26 }
 0x125   : > { %1283 = shalt.err (!%p1280_p8)
}
 0x126   : > { %s1332_s11 = smov 128   ;;  %s1333_s7 = smov 8  }
 0x127   : > { %1095 = dma.vmem_to_hbm [thread:$0]  (%p1416_p11), %s965_s9, 512, %s967_s8, %s952_s22, %s1332_s11, %s1332_s11, %s1333_s7  }
 0x128 PF: > { %s981_s16 = sand.u32 1, %s1314_s18   ;;  %p1783_p9 = scmp.ge.s32.totalorder %s1326_s21, 2 }
 0x129   : > { %s982_s10 = scalar_lea.sflag [#allocation4], %s981_s16 }
 0x12a   : > { %p1109_p10 = pnand %p1783_p9, %p1420_p12 }
 0x12c   : > { %p1110_p1 = pneg %p1109_p10 }
 0x12e   : > { %1309 = dma.done.wait (%p1110_p1), %s982_s10, 512  }
 0x12f   : > { %1311 = vsyncadd (%p1110_p1), %s982_s10, 4294966784  ;;  %p19_p2 = scmp.ge.s32.totalorder %s1389_s24, 4   ;;  %s1784_s18 = smov %s1318_s19 }
 0x130   : > { %s1785_s19 = smov %s1322_s20  ;;  %s1786_s20 = smov %s1401_s27 }
 0x131   : > { %s1787_s21 = smov %s1389_s24  ;;  %21 = sbr.rel (!%p19_p2) target bundleno = 9 (0x9), region = 94 }
 0x136   :  { %988 = vsyncpa [#allocation3], 1 }
 0x137   :  { %990 = vsyncpa [#allocation3 + $0x1], 1 }
 0x138   :  { %991 = vsyncpa [#allocation6], 1 }
 0x139   :  { %992 = vsyncpa [#allocation4], 1 }
 0x13a   :  { %994 = vsyncpa [#allocation4 + $0x1], 1 }

</bundles_post_ra>
